<compile_context>
chip_gen: v7x
topology: tpu7x:2x2x1
jax: 0.10.0
libtpu: 0.0.40
codegen_flags: <defaults>
</compile_context>

<pallas_src>
import functools

import jax
import jax.numpy as jnp
from jax import lax
from jax.experimental import pallas as pl
from jax.experimental.pallas import tpu as pltpu


def _round_up(x, m):
    return (x + m - 1) // m * m


def _sublane_min(dtype):
    return {4: 8, 2: 16, 1: 32}.get(jnp.dtype(dtype).itemsize, 8)


# -----------------------------------------------------------------------------
# Kernel: one (batch b, length-tile t) step.
#   ids_ref   : (B * Lp,) int32 in SMEM (scalar prefetch)
#   table_ref : (vocab_p, Dw_p) VMEM-resident table (same block every step)
#   out_ref   : (1, Lt, Dw_p) VMEM output block
# -----------------------------------------------------------------------------
def _embed_kernel(ids_ref, table_ref, out_ref, *, Lt, Lp, vocab_p):
    b = pl.program_id(0)
    t = pl.program_id(1)
    base = pl.multiple_of(b * Lp + t * Lt, Lt)

    # Hoist all SMEM id reads before any vector work (keeps the scalar /
    # addressing path off the critical path).
    ids = [ids_ref[base + j] for j in range(Lt)]

    # Splat the Lt scalar ids into an (Lt, 1) column via sublane-iota selects
    # (no lane<->sublane relayout needed).
    row_iota = lax.broadcasted_iota(jnp.int32, (Lt, 1), 0)
    ids_col = jnp.zeros((Lt, 1), jnp.int32)
    for j in range(Lt):
        ids_col = jnp.where(row_iota == j, ids[j], ids_col)

    # One-hot gather matrix; a single MXU matmul pulls the Lt embedding rows
    # out of the resident table, producing one lane/sublane-dense (Lt, Dw_p)
    # tile that is stored once.
    vocab_iota = lax.broadcasted_iota(jnp.int32, (Lt, vocab_p), 1)
    one_hot = (ids_col == vocab_iota).astype(table_ref.dtype)
    rows = jnp.dot(one_hot, table_ref[...], preferred_element_type=jnp.float32)
    out_ref[0, :, :] = rows.astype(out_ref.dtype)


def embedding_forward(word_mat, wids):
    """Frozen-embedding lookup: (B, L) ids -> (B, L, Dw) rows of word_mat."""
    vocab, Dw = word_mat.shape
    B, L = wids.shape
    dtype = word_mat.dtype
    dt_bytes = jnp.dtype(dtype).itemsize

    # ---- tiling / padding ---------------------------------------------------
    sub = _sublane_min(dtype)                  # sublane minimum for this dtype
    Dw_p = _round_up(Dw, 128)                  # lane-dense rows / stores
    vocab_p = _round_up(vocab, 128)            # aligned MXU contraction dim
    Lt = min(32, _round_up(L, sub))            # tokens per step (mult. of sub)
    Lp = _round_up(L, Lt)
    nT = Lp // Lt

    # ---- VMEM footprint (v7x: 64 MiB physical / 32 MiB default scoped) ------
    table_bytes = vocab_p * Dw_p * dt_bytes
    out_bytes = 2 * Lt * Dw_p * dt_bytes       # double-buffered output block
    footprint = table_bytes + out_bytes
    budget = 24 * 1024 * 1024                  # v7x-safe; ~2x headroom on v5e/v6e
    assert footprint <= budget, (
        f"padded embedding table ({footprint / 2**20:.1f} MiB) exceeds the "
        f"v7x-safe VMEM budget ({budget // 2**20} MiB); use the HBM DMA-gather "
        f"path instead")  # TODO(synk): implement the pl.ANY manual-gather path.

    table = word_mat
    if (vocab_p, Dw_p) != (vocab, Dw):
        table = jnp.pad(word_mat, ((0, vocab_p - vocab), (0, Dw_p - Dw)))

    ids = wids.astype(jnp.int32)
    if Lp != L:
        ids = jnp.pad(ids, ((0, 0), (0, Lp - L)))
    ids_flat = ids.reshape(B * Lp)             # 1-D SMEM layout (no 2-D padding)

    kernel = functools.partial(_embed_kernel, Lt=Lt, Lp=Lp, vocab_p=vocab_p)

    grid_spec = pltpu.PrefetchScalarGridSpec(
        num_scalar_prefetch=1,                 # ids -> SMEM before the grid runs
        grid=(B, nT),
        in_specs=[
            # Whole (padded) table resident in VMEM: constant block index, so
            # it is fetched from HBM exactly once.
            pl.BlockSpec((vocab_p, Dw_p), lambda b, t, ids: (0, 0)),
        ],
        out_specs=pl.BlockSpec((1, Lt, Dw_p), lambda b, t, ids: (b, t, 0)),
    )

    out = pl.pallas_call(
        kernel,
        grid_spec=grid_spec,
        out_shape=jax.ShapeDtypeStruct((B, Lp, Dw_p), dtype),
        compiler_params=pltpu.CompilerParams(
            dimension_semantics=("parallel", "parallel"),  # v7x: 2 TCs share steps
            vmem_limit_bytes=32 * 1024 * 1024),
        cost_estimate=pl.CostEstimate(
            flops=2 * B * nT * Lt * vocab_p * Dw_p,
            transcendentals=0,
            bytes_accessed=(table_bytes + ids_flat.size * 4
                            + B * Lp * Dw_p * dt_bytes)),
    )(ids_flat, table)

    return out[:, :L, :Dw]


# -----------------------------------------------------------------------------
# Example run.
# -----------------------------------------------------------------------------
if __name__ == "__main__":
    B, L = 2, 40                 # batch, sequence length (exercises L padding/tiling)
    vocab, dim_word = 1000, 128  # frozen table (vocab padded to 1024 in-kernel)

    key = jax.random.PRNGKey(0)
    k_mat, k_ids = jax.random.split(key)
    word_mat = jax.random.uniform(k_mat, (vocab, dim_word), jnp.float32, -0.5, 0.5)
    wids = jax.random.randint(k_ids, (B, L), 0, vocab)

    out = embedding_forward(word_mat, wids)
    out = jax.block_until_ready(out)

    # Pure-JAX reference (what nn.Embedding.from_pretrained(..., freeze=True)
    # followed by .view(batch, length, -1) computes).
    ref = word_mat[wids]
    assert out.shape == (B, L, dim_word)
    assert jnp.allclose(out, ref)
    print("KERNEL_OK")
</pallas_src>

<mosaic_0001>
module attributes {stable_mosaic.version = 11 : i64} {
  func.func @_embed_kernel(%arg0: i32, %arg1: i32, %arg2: memref<128xi32, #tpu.memory_space<smem>>, %arg3: memref<1024x128xf32, #tpu.memory_space<vmem>>, %arg4: memref<1x32x128xf32, #tpu.memory_space<vmem>>) attributes {dimension_semantics = [#tpu.dimension_semantics<parallel>, #tpu.dimension_semantics<parallel>], iteration_bounds = array<i64: 2, 2>, scalar_prefetch = 1 : i64, scratch_operands = 0 : i64, tpu.core_type = #tpu.core_type<tc>, window_params = [{pipeline_mode = #tpu.pipeline_mode<synchronous>, transform_indices = @transform_0, window_bounds = array<i64: 1024, 128>}, {transform_indices = @transform_1, window_bounds = array<i64: 1, 32, 128>}]} {
    %c64_i32 = arith.constant 64 : i32
    %0 = arith.muli %arg0, %c64_i32 : i32
    %c32_i32 = arith.constant 32 : i32
    %1 = arith.muli %arg1, %c32_i32 : i32
    %2 = arith.addi %0, %1 : i32
    %3 = tpu.assume_multiple %2, 32 : i32
    %c0_i32 = arith.constant 0 : i32
    %4 = arith.addi %3, %c0_i32 : i32
    %5 = arith.index_cast %4 : i32 to index
    %6 = memref.load %arg2[%5] : memref<128xi32, #tpu.memory_space<smem>>
    %c1_i32 = arith.constant 1 : i32
    %7 = arith.addi %3, %c1_i32 : i32
    %8 = arith.index_cast %7 : i32 to index
    %9 = memref.load %arg2[%8] : memref<128xi32, #tpu.memory_space<smem>>
    %c2_i32 = arith.constant 2 : i32
    %10 = arith.addi %3, %c2_i32 : i32
    %11 = arith.index_cast %10 : i32 to index
    %12 = memref.load %arg2[%11] : memref<128xi32, #tpu.memory_space<smem>>
    %c3_i32 = arith.constant 3 : i32
    %13 = arith.addi %3, %c3_i32 : i32
    %14 = arith.index_cast %13 : i32 to index
    %15 = memref.load %arg2[%14] : memref<128xi32, #tpu.memory_space<smem>>
    %c4_i32 = arith.constant 4 : i32
    %16 = arith.addi %3, %c4_i32 : i32
    %17 = arith.index_cast %16 : i32 to index
    %18 = memref.load %arg2[%17] : memref<128xi32, #tpu.memory_space<smem>>
    %c5_i32 = arith.constant 5 : i32
    %19 = arith.addi %3, %c5_i32 : i32
    %20 = arith.index_cast %19 : i32 to index
    %21 = memref.load %arg2[%20] : memref<128xi32, #tpu.memory_space<smem>>
    %c6_i32 = arith.constant 6 : i32
    %22 = arith.addi %3, %c6_i32 : i32
    %23 = arith.index_cast %22 : i32 to index
    %24 = memref.load %arg2[%23] : memref<128xi32, #tpu.memory_space<smem>>
    %c7_i32 = arith.constant 7 : i32
    %25 = arith.addi %3, %c7_i32 : i32
    %26 = arith.index_cast %25 : i32 to index
    %27 = memref.load %arg2[%26] : memref<128xi32, #tpu.memory_space<smem>>
    %c8_i32 = arith.constant 8 : i32
    %28 = arith.addi %3, %c8_i32 : i32
    %29 = arith.index_cast %28 : i32 to index
    %30 = memref.load %arg2[%29] : memref<128xi32, #tpu.memory_space<smem>>
    %c9_i32 = arith.constant 9 : i32
    %31 = arith.addi %3, %c9_i32 : i32
    %32 = arith.index_cast %31 : i32 to index
    %33 = memref.load %arg2[%32] : memref<128xi32, #tpu.memory_space<smem>>
    %c10_i32 = arith.constant 10 : i32
    %34 = arith.addi %3, %c10_i32 : i32
    %35 = arith.index_cast %34 : i32 to index
    %36 = memref.load %arg2[%35] : memref<128xi32, #tpu.memory_space<smem>>
    %c11_i32 = arith.constant 11 : i32
    %37 = arith.addi %3, %c11_i32 : i32
    %38 = arith.index_cast %37 : i32 to index
    %39 = memref.load %arg2[%38] : memref<128xi32, #tpu.memory_space<smem>>
    %c12_i32 = arith.constant 12 : i32
    %40 = arith.addi %3, %c12_i32 : i32
    %41 = arith.index_cast %40 : i32 to index
    %42 = memref.load %arg2[%41] : memref<128xi32, #tpu.memory_space<smem>>
    %c13_i32 = arith.constant 13 : i32
    %43 = arith.addi %3, %c13_i32 : i32
    %44 = arith.index_cast %43 : i32 to index
    %45 = memref.load %arg2[%44] : memref<128xi32, #tpu.memory_space<smem>>
    %c14_i32 = arith.constant 14 : i32
    %46 = arith.addi %3, %c14_i32 : i32
    %47 = arith.index_cast %46 : i32 to index
    %48 = memref.load %arg2[%47] : memref<128xi32, #tpu.memory_space<smem>>
    %c15_i32 = arith.constant 15 : i32
    %49 = arith.addi %3, %c15_i32 : i32
    %50 = arith.index_cast %49 : i32 to index
    %51 = memref.load %arg2[%50] : memref<128xi32, #tpu.memory_space<smem>>
    %c16_i32 = arith.constant 16 : i32
    %52 = arith.addi %3, %c16_i32 : i32
    %53 = arith.index_cast %52 : i32 to index
    %54 = memref.load %arg2[%53] : memref<128xi32, #tpu.memory_space<smem>>
    %c17_i32 = arith.constant 17 : i32
    %55 = arith.addi %3, %c17_i32 : i32
    %56 = arith.index_cast %55 : i32 to index
    %57 = memref.load %arg2[%56] : memref<128xi32, #tpu.memory_space<smem>>
    %c18_i32 = arith.constant 18 : i32
    %58 = arith.addi %3, %c18_i32 : i32
    %59 = arith.index_cast %58 : i32 to index
    %60 = memref.load %arg2[%59] : memref<128xi32, #tpu.memory_space<smem>>
    %c19_i32 = arith.constant 19 : i32
    %61 = arith.addi %3, %c19_i32 : i32
    %62 = arith.index_cast %61 : i32 to index
    %63 = memref.load %arg2[%62] : memref<128xi32, #tpu.memory_space<smem>>
    %c20_i32 = arith.constant 20 : i32
    %64 = arith.addi %3, %c20_i32 : i32
    %65 = arith.index_cast %64 : i32 to index
    %66 = memref.load %arg2[%65] : memref<128xi32, #tpu.memory_space<smem>>
    %c21_i32 = arith.constant 21 : i32
    %67 = arith.addi %3, %c21_i32 : i32
    %68 = arith.index_cast %67 : i32 to index
    %69 = memref.load %arg2[%68] : memref<128xi32, #tpu.memory_space<smem>>
    %c22_i32 = arith.constant 22 : i32
    %70 = arith.addi %3, %c22_i32 : i32
    %71 = arith.index_cast %70 : i32 to index
    %72 = memref.load %arg2[%71] : memref<128xi32, #tpu.memory_space<smem>>
    %c23_i32 = arith.constant 23 : i32
    %73 = arith.addi %3, %c23_i32 : i32
    %74 = arith.index_cast %73 : i32 to index
    %75 = memref.load %arg2[%74] : memref<128xi32, #tpu.memory_space<smem>>
    %c24_i32 = arith.constant 24 : i32
    %76 = arith.addi %3, %c24_i32 : i32
    %77 = arith.index_cast %76 : i32 to index
    %78 = memref.load %arg2[%77] : memref<128xi32, #tpu.memory_space<smem>>
    %c25_i32 = arith.constant 25 : i32
    %79 = arith.addi %3, %c25_i32 : i32
    %80 = arith.index_cast %79 : i32 to index
    %81 = memref.load %arg2[%80] : memref<128xi32, #tpu.memory_space<smem>>
    %c26_i32 = arith.constant 26 : i32
    %82 = arith.addi %3, %c26_i32 : i32
    %83 = arith.index_cast %82 : i32 to index
    %84 = memref.load %arg2[%83] : memref<128xi32, #tpu.memory_space<smem>>
    %c27_i32 = arith.constant 27 : i32
    %85 = arith.addi %3, %c27_i32 : i32
    %86 = arith.index_cast %85 : i32 to index
    %87 = memref.load %arg2[%86] : memref<128xi32, #tpu.memory_space<smem>>
    %c28_i32 = arith.constant 28 : i32
    %88 = arith.addi %3, %c28_i32 : i32
    %89 = arith.index_cast %88 : i32 to index
    %90 = memref.load %arg2[%89] : memref<128xi32, #tpu.memory_space<smem>>
    %c29_i32 = arith.constant 29 : i32
    %91 = arith.addi %3, %c29_i32 : i32
    %92 = arith.index_cast %91 : i32 to index
    %93 = memref.load %arg2[%92] : memref<128xi32, #tpu.memory_space<smem>>
    %c30_i32 = arith.constant 30 : i32
    %94 = arith.addi %3, %c30_i32 : i32
    %95 = arith.index_cast %94 : i32 to index
    %96 = memref.load %arg2[%95] : memref<128xi32, #tpu.memory_space<smem>>
    %c31_i32 = arith.constant 31 : i32
    %97 = arith.addi %3, %c31_i32 : i32
    %98 = arith.index_cast %97 : i32 to index
    %99 = memref.load %arg2[%98] : memref<128xi32, #tpu.memory_space<smem>>
    %100 = tpu.iota {dimensions = array<i32: 0>} : vector<32x1xi32>
    %c0_i32_0 = arith.constant 0 : i32
    %101 = vector.broadcast %c0_i32_0 : i32 to vector<32x1xi32>
    %c0_i32_1 = arith.constant 0 : i32
    %102 = vector.broadcast %c0_i32_1 : i32 to vector<32x1xi32>
    %103 = arith.cmpi eq, %100, %102 : vector<32x1xi32>
    %104 = vector.broadcast %6 : i32 to vector<32x1xi32>
    %105 = arith.select %103, %104, %101 : vector<32x1xi1>, vector<32x1xi32>
    %c1_i32_2 = arith.constant 1 : i32
    %106 = vector.broadcast %c1_i32_2 : i32 to vector<32x1xi32>
    %107 = arith.cmpi eq, %100, %106 : vector<32x1xi32>
    %108 = vector.broadcast %9 : i32 to vector<32x1xi32>
    %109 = arith.select %107, %108, %105 : vector<32x1xi1>, vector<32x1xi32>
    %c2_i32_3 = arith.constant 2 : i32
    %110 = vector.broadcast %c2_i32_3 : i32 to vector<32x1xi32>
    %111 = arith.cmpi eq, %100, %110 : vector<32x1xi32>
    %112 = vector.broadcast %12 : i32 to vector<32x1xi32>
    %113 = arith.select %111, %112, %109 : vector<32x1xi1>, vector<32x1xi32>
    %c3_i32_4 = arith.constant 3 : i32
    %114 = vector.broadcast %c3_i32_4 : i32 to vector<32x1xi32>
    %115 = arith.cmpi eq, %100, %114 : vector<32x1xi32>
    %116 = vector.broadcast %15 : i32 to vector<32x1xi32>
    %117 = arith.select %115, %116, %113 : vector<32x1xi1>, vector<32x1xi32>
    %c4_i32_5 = arith.constant 4 : i32
    %118 = vector.broadcast %c4_i32_5 : i32 to vector<32x1xi32>
    %119 = arith.cmpi eq, %100, %118 : vector<32x1xi32>
    %120 = vector.broadcast %18 : i32 to vector<32x1xi32>
    %121 = arith.select %119, %120, %117 : vector<32x1xi1>, vector<32x1xi32>
    %c5_i32_6 = arith.constant 5 : i32
    %122 = vector.broadcast %c5_i32_6 : i32 to vector<32x1xi32>
    %123 = arith.cmpi eq, %100, %122 : vector<32x1xi32>
    %124 = vector.broadcast %21 : i32 to vector<32x1xi32>
    %125 = arith.select %123, %124, %121 : vector<32x1xi1>, vector<32x1xi32>
    %c6_i32_7 = arith.constant 6 : i32
    %126 = vector.broadcast %c6_i32_7 : i32 to vector<32x1xi32>
    %127 = arith.cmpi eq, %100, %126 : vector<32x1xi32>
    %128 = vector.broadcast %24 : i32 to vector<32x1xi32>
    %129 = arith.select %127, %128, %125 : vector<32x1xi1>, vector<32x1xi32>
    %c7_i32_8 = arith.constant 7 : i32
    %130 = vector.broadcast %c7_i32_8 : i32 to vector<32x1xi32>
    %131 = arith.cmpi eq, %100, %130 : vector<32x1xi32>
    %132 = vector.broadcast %27 : i32 to vector<32x1xi32>
    %133 = arith.select %131, %132, %129 : vector<32x1xi1>, vector<32x1xi32>
    %c8_i32_9 = arith.constant 8 : i32
    %134 = vector.broadcast %c8_i32_9 : i32 to vector<32x1xi32>
    %135 = arith.cmpi eq, %100, %134 : vector<32x1xi32>
    %136 = vector.broadcast %30 : i32 to vector<32x1xi32>
    %137 = arith.select %135, %136, %133 : vector<32x1xi1>, vector<32x1xi32>
    %c9_i32_10 = arith.constant 9 : i32
    %138 = vector.broadcast %c9_i32_10 : i32 to vector<32x1xi32>
    %139 = arith.cmpi eq, %100, %138 : vector<32x1xi32>
    %140 = vector.broadcast %33 : i32 to vector<32x1xi32>
    %141 = arith.select %139, %140, %137 : vector<32x1xi1>, vector<32x1xi32>
    %c10_i32_11 = arith.constant 10 : i32
    %142 = vector.broadcast %c10_i32_11 : i32 to vector<32x1xi32>
    %143 = arith.cmpi eq, %100, %142 : vector<32x1xi32>
    %144 = vector.broadcast %36 : i32 to vector<32x1xi32>
    %145 = arith.select %143, %144, %141 : vector<32x1xi1>, vector<32x1xi32>
    %c11_i32_12 = arith.constant 11 : i32
    %146 = vector.broadcast %c11_i32_12 : i32 to vector<32x1xi32>
    %147 = arith.cmpi eq, %100, %146 : vector<32x1xi32>
    %148 = vector.broadcast %39 : i32 to vector<32x1xi32>
    %149 = arith.select %147, %148, %145 : vector<32x1xi1>, vector<32x1xi32>
    %c12_i32_13 = arith.constant 12 : i32
    %150 = vector.broadcast %c12_i32_13 : i32 to vector<32x1xi32>
    %151 = arith.cmpi eq, %100, %150 : vector<32x1xi32>
    %152 = vector.broadcast %42 : i32 to vector<32x1xi32>
    %153 = arith.select %151, %152, %149 : vector<32x1xi1>, vector<32x1xi32>
    %c13_i32_14 = arith.constant 13 : i32
    %154 = vector.broadcast %c13_i32_14 : i32 to vector<32x1xi32>
    %155 = arith.cmpi eq, %100, %154 : vector<32x1xi32>
    %156 = vector.broadcast %45 : i32 to vector<32x1xi32>
    %157 = arith.select %155, %156, %153 : vector<32x1xi1>, vector<32x1xi32>
    %c14_i32_15 = arith.constant 14 : i32
    %158 = vector.broadcast %c14_i32_15 : i32 to vector<32x1xi32>
    %159 = arith.cmpi eq, %100, %158 : vector<32x1xi32>
    %160 = vector.broadcast %48 : i32 to vector<32x1xi32>
    %161 = arith.select %159, %160, %157 : vector<32x1xi1>, vector<32x1xi32>
    %c15_i32_16 = arith.constant 15 : i32
    %162 = vector.broadcast %c15_i32_16 : i32 to vector<32x1xi32>
    %163 = arith.cmpi eq, %100, %162 : vector<32x1xi32>
    %164 = vector.broadcast %51 : i32 to vector<32x1xi32>
    %165 = arith.select %163, %164, %161 : vector<32x1xi1>, vector<32x1xi32>
    %c16_i32_17 = arith.constant 16 : i32
    %166 = vector.broadcast %c16_i32_17 : i32 to vector<32x1xi32>
    %167 = arith.cmpi eq, %100, %166 : vector<32x1xi32>
    %168 = vector.broadcast %54 : i32 to vector<32x1xi32>
    %169 = arith.select %167, %168, %165 : vector<32x1xi1>, vector<32x1xi32>
    %c17_i32_18 = arith.constant 17 : i32
    %170 = vector.broadcast %c17_i32_18 : i32 to vector<32x1xi32>
    %171 = arith.cmpi eq, %100, %170 : vector<32x1xi32>
    %172 = vector.broadcast %57 : i32 to vector<32x1xi32>
    %173 = arith.select %171, %172, %169 : vector<32x1xi1>, vector<32x1xi32>
    %c18_i32_19 = arith.constant 18 : i32
    %174 = vector.broadcast %c18_i32_19 : i32 to vector<32x1xi32>
    %175 = arith.cmpi eq, %100, %174 : vector<32x1xi32>
    %176 = vector.broadcast %60 : i32 to vector<32x1xi32>
    %177 = arith.select %175, %176, %173 : vector<32x1xi1>, vector<32x1xi32>
    %c19_i32_20 = arith.constant 19 : i32
    %178 = vector.broadcast %c19_i32_20 : i32 to vector<32x1xi32>
    %179 = arith.cmpi eq, %100, %178 : vector<32x1xi32>
    %180 = vector.broadcast %63 : i32 to vector<32x1xi32>
    %181 = arith.select %179, %180, %177 : vector<32x1xi1>, vector<32x1xi32>
    %c20_i32_21 = arith.constant 20 : i32
    %182 = vector.broadcast %c20_i32_21 : i32 to vector<32x1xi32>
    %183 = arith.cmpi eq, %100, %182 : vector<32x1xi32>
    %184 = vector.broadcast %66 : i32 to vector<32x1xi32>
    %185 = arith.select %183, %184, %181 : vector<32x1xi1>, vector<32x1xi32>
    %c21_i32_22 = arith.constant 21 : i32
    %186 = vector.broadcast %c21_i32_22 : i32 to vector<32x1xi32>
    %187 = arith.cmpi eq, %100, %186 : vector<32x1xi32>
    %188 = vector.broadcast %69 : i32 to vector<32x1xi32>
    %189 = arith.select %187, %188, %185 : vector<32x1xi1>, vector<32x1xi32>
    %c22_i32_23 = arith.constant 22 : i32
    %190 = vector.broadcast %c22_i32_23 : i32 to vector<32x1xi32>
    %191 = arith.cmpi eq, %100, %190 : vector<32x1xi32>
    %192 = vector.broadcast %72 : i32 to vector<32x1xi32>
    %193 = arith.select %191, %192, %189 : vector<32x1xi1>, vector<32x1xi32>
    %c23_i32_24 = arith.constant 23 : i32
    %194 = vector.broadcast %c23_i32_24 : i32 to vector<32x1xi32>
    %195 = arith.cmpi eq, %100, %194 : vector<32x1xi32>
    %196 = vector.broadcast %75 : i32 to vector<32x1xi32>
    %197 = arith.select %195, %196, %193 : vector<32x1xi1>, vector<32x1xi32>
    %c24_i32_25 = arith.constant 24 : i32
    %198 = vector.broadcast %c24_i32_25 : i32 to vector<32x1xi32>
    %199 = arith.cmpi eq, %100, %198 : vector<32x1xi32>
    %200 = vector.broadcast %78 : i32 to vector<32x1xi32>
    %201 = arith.select %199, %200, %197 : vector<32x1xi1>, vector<32x1xi32>
    %c25_i32_26 = arith.constant 25 : i32
    %202 = vector.broadcast %c25_i32_26 : i32 to vector<32x1xi32>
    %203 = arith.cmpi eq, %100, %202 : vector<32x1xi32>
    %204 = vector.broadcast %81 : i32 to vector<32x1xi32>
    %205 = arith.select %203, %204, %201 : vector<32x1xi1>, vector<32x1xi32>
    %c26_i32_27 = arith.constant 26 : i32
    %206 = vector.broadcast %c26_i32_27 : i32 to vector<32x1xi32>
    %207 = arith.cmpi eq, %100, %206 : vector<32x1xi32>
    %208 = vector.broadcast %84 : i32 to vector<32x1xi32>
    %209 = arith.select %207, %208, %205 : vector<32x1xi1>, vector<32x1xi32>
    %c27_i32_28 = arith.constant 27 : i32
    %210 = vector.broadcast %c27_i32_28 : i32 to vector<32x1xi32>
    %211 = arith.cmpi eq, %100, %210 : vector<32x1xi32>
    %212 = vector.broadcast %87 : i32 to vector<32x1xi32>
    %213 = arith.select %211, %212, %209 : vector<32x1xi1>, vector<32x1xi32>
    %c28_i32_29 = arith.constant 28 : i32
    %214 = vector.broadcast %c28_i32_29 : i32 to vector<32x1xi32>
    %215 = arith.cmpi eq, %100, %214 : vector<32x1xi32>
    %216 = vector.broadcast %90 : i32 to vector<32x1xi32>
    %217 = arith.select %215, %216, %213 : vector<32x1xi1>, vector<32x1xi32>
    %c29_i32_30 = arith.constant 29 : i32
    %218 = vector.broadcast %c29_i32_30 : i32 to vector<32x1xi32>
    %219 = arith.cmpi eq, %100, %218 : vector<32x1xi32>
    %220 = vector.broadcast %93 : i32 to vector<32x1xi32>
    %221 = arith.select %219, %220, %217 : vector<32x1xi1>, vector<32x1xi32>
    %c30_i32_31 = arith.constant 30 : i32
    %222 = vector.broadcast %c30_i32_31 : i32 to vector<32x1xi32>
    %223 = arith.cmpi eq, %100, %222 : vector<32x1xi32>
    %224 = vector.broadcast %96 : i32 to vector<32x1xi32>
    %225 = arith.select %223, %224, %221 : vector<32x1xi1>, vector<32x1xi32>
    %c31_i32_32 = arith.constant 31 : i32
    %226 = vector.broadcast %c31_i32_32 : i32 to vector<32x1xi32>
    %227 = arith.cmpi eq, %100, %226 : vector<32x1xi32>
    %228 = vector.broadcast %99 : i32 to vector<32x1xi32>
    %229 = arith.select %227, %228, %225 : vector<32x1xi1>, vector<32x1xi32>
    %230 = tpu.iota {dimensions = array<i32: 1>} : vector<32x1024xi32>
    %231 = vector.broadcast %229 : vector<32x1xi32> to vector<32x1024xi32>
    %232 = arith.cmpi eq, %231, %230 : vector<32x1024xi32>
    %233 = arith.extui %232 : vector<32x1024xi1> to vector<32x1024xi32>
    %234 = arith.sitofp %233 : vector<32x1024xi32> to vector<32x1024xf32>
    %c0 = arith.constant 0 : index
    %c0_33 = arith.constant 0 : index
    %235 = vector.load %arg3[%c0, %c0_33] : memref<1024x128xf32, #tpu.memory_space<vmem>>, vector<1024x128xf32>
    %cst = arith.constant dense<0.000000e+00> : vector<32x128xf32>
    %236 = tpu.matmul %234, %235, %cst {dimension_numbers = #tpu.dot_dimension_numbers<[1], [0], [0], [1], [0, 0, 1, 1], [], []>} : vector<32x1024xf32>, vector<1024x128xf32>, vector<32x128xf32> -> vector<32x128xf32>
    %c0_34 = arith.constant 0 : index
    %c0_35 = arith.constant 0 : index
    %c0_36 = arith.constant 0 : index
    %237 = vector.load %arg4[%c0_34, %c0_35, %c0_36] : memref<1x32x128xf32, #tpu.memory_space<vmem>>, vector<1x32x128xf32>
    %238 = vector.shape_cast %237 : vector<1x32x128xf32> to vector<32x128xf32>
    %239 = vector.shape_cast %236 : vector<32x128xf32> to vector<1x32x128xf32>
    tpu.vector_store %arg4[%c0_34, %c0_35, %c0_36], %239 {strides = array<i32>} : memref<1x32x128xf32, #tpu.memory_space<vmem>>, vector<1x32x128xf32>,
    return
  }
  func.func @transform_0(%arg0: i32, %arg1: i32, %arg2: memref<128xi32, #tpu.memory_space<smem>>) -> (i32, i32) {
    %c0_i32 = arith.constant 0 : i32
    %c0_i32_0 = arith.constant 0 : i32
    %c0_i32_1 = arith.constant 0 : i32
    return %c0_i32, %c0_i32_0 : i32, i32
  }
  func.func @transform_1(%arg0: i32, %arg1: i32, %arg2: memref<128xi32, #tpu.memory_space<smem>>) -> (i32, i32, i32) {
    %c0_i32 = arith.constant 0 : i32
    %c0_i32_0 = arith.constant 0 : i32
    return %arg0, %arg1, %c0_i32 : i32, i32, i32
  }
}

</mosaic_0001>

<bundles_post_ra>
// kernel: tpu_custom_call.1
= control target key start
LH: loop header
LB: loop body
LE: loop exit
PB: predicated region body
PF: predicated region fallthrough
CT: control target
= control target key end

     0   :  { %s2445_s0 = inlined_call_operand.hbm [shape: s32[128], index: 0, kind: input, shape index: {}]   ;;  %s2446_s1 = inlined_call_operand.hbm [shape: f32[1024,128], index: 1, kind: input, shape index: {}]   ;;  %s2447_s2 = inlined_call_operand.hbm [shape: f32[2,64,128], index: 2, kind: output, shape index: {}]  }
   0x1   :  { %s1629_s11 = scalar_lea.hbm %s2445_s0, 16 }
   0x2   :  { %p1630_p0 = scmp.ne.s32.totalorder %s2445_s0, %s1629_s11  ;;  %p1633_p1 = scmp.lt.u32.totalorder %s1629_s11, %s2445_s0 }
   0x4   :  { %p1635_p2 = pnand %p1633_p1, %p1630_p0 }
   0x6   :  { %1638 = shalt.err (!%p1635_p2)  }
   0x7   :  { %s1769_s16 = smov [#allocation3]  }
   0x8   :  { %8 = dma.hbm_to_smem %s2445_s0, 16, %s1769_s16, [#allocation2] }
   0x9   :  { %1727 = dma.done.wait [#allocation2], 16 }
   0xa   :  { %1728 = vsyncadd [#allocation2], 4294967280 }
   0xb   :  { %10 = sfence }
   0xc   :  { %11 = vsyncpa [#allocation5], 0 }
   0xd   :  { %12 = vsyncpa [#allocation6], 0 }
   0xe   :  { %14 = vsyncpa [#allocation6 + $0x1], 0  ;;  %s1804_s19 = smov 0   ;;  %s1806_s20 = smov 0  }
   0xf   :  { %s1808_s21 = smov 0   ;;  %s1810_s22 = smov 0  }
  0x10   :  { %s1812_s23 = smov 0   ;;  %s1814_s24 = smov 0  }
  0x11   :  { %s1816_s25 = smov 0   ;;  %s1818_s0 = smov 0  }
  0x12 LB: > { %s1158_s26 = sadd.s32 4294967295, %s1767_s0   ;;  %s1159_s27 = sadd.s32 4294967294, %s1767_s0   ;;  %s1767_s0 = sphi %s1818_s0, %s20_s0   ;;  %s1763_s25 = sphi %s1816_s25, %s2467_s25   ;;  %s1759_s24 = sphi %s1814_s24, %s2466_s24   ;;  %s1755_s23 = sphi %s1812_s23, %s2465_s23   ;;  %s1751_s22 = sphi %s1810_s22, %s2464_s22   ;;  %s1747_s21 = sphi %s1808_s21, %s2463_s21   ;;  %s1743_s20 = sphi %s1806_s20, %s2462_s20   ;;  %s1739_s19 = sphi %s1804_s19, %s2461_s19  }
  0x13   : > { %s29_s28 = sadd.s32 1, %s1759_s24  ;;  %s32_s29 = sadd.s32 1, %s1763_s25 }
  0x14   : > { %p30_p3 = scmp.ge.s32.totalorder %s29_s28, 2  ;;  %s62_s30 = sadd.s32 1, %s1747_s21 }
  0x15   : > { %p72_p4 = scmp.ne.s32.totalorder %s1747_s21, %s1743_s20  ;;  %p73_p5 = scmp.eq.s32.totalorder %s1158_s26, 3 }
  0x16   : > { %s2469_s28 = smov (%p30_p3, %s29_s28), 0  ;;  %s2471_s29 = smov (!%p30_p3, %s32_s29), %s1763_s25 }
  0x17   : > { %s58_s3 = ssub.s32 %s1759_s24, %s2469_s28  ;;  %p1856_p6 = por %p73_p5, %p72_p4 }
  0x18   : > { %p34_p7 = scmp.ge.s32.totalorder %s2471_s29, 2  ;;  %p78_p8 = scmp.ne.s32.totalorder %s1743_s20, %s1739_s19 }
  0x19   : > { %s2452_s4 = scalar_select %p1856_p6, 1, 0 }
  0x1a   : > { %p79_p9 = scmp.eq.s32.totalorder %s1159_s27, 3  ;;  %p1160_p10 = scmp.ge.s32.totalorder %s1767_s0, 1 }
  0x1b   : > { %s2473_s29 = smov (%p34_p7, %s2471_s29), 0  ;;  %p86_p12 = scmp.lt.s32.totalorder %s1767_s0, 5 }
  0x1c   : > { %p1865_p11 = por %p79_p9, %p78_p8  ;;  %s57_s6 = ssub.s32 %s1763_s25, %s2473_s29 }
  0x1d   : > { %s59_s7 = sor.u32 %s58_s3, %s57_s6  ;;  %p1872_p13 = pnand %p1160_p10, %p86_p12 }
  0x1e   : > { %s2453_s5 = scalar_select %p1865_p11, 1, 0 }
  0x1f   : > { %s2454_s8 = scalar_select %p1872_p13, 1, 0 }
  0x20   : > { %p60_p0 = scmp.eq.s32.totalorder %s59_s7, 0  ;;  %p1876_p1 = scmp.eq.s32.totalorder %s1158_s26, 0 }
  0x21   : > { %p1547_p2 = pneg %p1872_p13  ;;  %s1770_s11 = smov [#allocation4]  }
  0x22   : > { %s2455_s9 = scalar_select %p1876_p1, 1, 0 }
  0x23   : > { %s1883_s10 = scalar_select %p60_p0, %s1747_s21, %s62_s30  }
  0x24   : > { %s98_s12 = sshll.u32 %s1770_s11, 4  ;;  %p1887_p3 = pnand %p1876_p1, %p1547_p2  ;;  %s99_s12 = int_to_ptr.vmem [resolvable:$true] %s98_s12 }
  0x25   : > { %s1639_s16 = scalar_lea.hbm %s2446_s1, 16384 }
  0x26   : > { %p1640_p4 = scmp.ne.s32.totalorder %s2446_s1, %s1639_s16  ;;  %p1641_p5 = pneg %p1887_p3 }
  0x27   : > { %p1646_p9 = scmp.lt.u32.totalorder %s1639_s16, %s2446_s1 }
  0x28   : > { %p1642_p7 = pnand %p1641_p5, %p1640_p4 }
  0x2a   : > { %p1643_p8 = pneg %p1642_p7 }
  0x2c   : > { %p1648_p10 = pnand %p1646_p9, %p1643_p8 }
  0x2e   : > { %1651 = shalt.err (!%p1648_p10)
}
  0x2f   : > { %s1652_s30 = scalar_lea.vmem %s99_s12, 16384  ;;  %p1660_p11 = scmp.lt.s32.totalorder %s99_s12, %s99_s12 }
  0x30   : > { %p1653_p12 = scmp.ne.s32.totalorder %s99_s12, %s1652_s30  ;;  %p1661_p6 = scmp.lt.s32.totalorder %s1652_s30, %s1652_s30 }
  0x32   : > { %p1655_p0 = pnand %p1653_p12, %p1641_p5  ;;  %p1662_p1 = por %p1661_p6, %p1660_p11 }
  0x34   : > { %p1656_p2 = pneg %p1655_p0 }
  0x36   : > { %p1663_p13 = pnand %p1662_p1, %p1656_p2 }
  0x38   : > { %1666 = shalt.err (!%p1663_p13)
}
  0x39   : > { %s1771_s3 = smov 128   ;;  %s1772_s6 = smov 8  }
  0x3a   : > { %1550 = dma.hbm_to_vmem [thread:$0]  (!%p1887_p3), %s2446_s1, 16384, %s99_s12, [#allocation5], %s1771_s3, %s1771_s3, %s1772_s6  }
  0x3b   : > { %p2457_p4 = scmp.ne.s32.totalorder %s2454_s8, 0 }
  0x3c   : > { %p2458_p7 = scmp.ne.s32.totalorder (!%p2457_p4), %s2455_s9, 0 }
  0x3d   : > { %114 = sbr.rel (%p2457_p4) target bundleno = 385 (0x181), region = 24 }
  0x44   : > { %1730 = dma.done.wait (%p2458_p7), [#allocation5], 16384  }
  0x45   : > { %1732 = vsyncadd (%p2458_p7), [#allocation5], 4294950912  ;;  %s1165_s14 = sshll.u32 %s1755_s23, 6  ;;  %s1166_s15 = sshll.u32 %s1751_s22, 5  ;;  %v196_v0 = vlaneseq  ;;  %v610_v4 = vld [vmem:[#allocation4 + $0x80] sm:$0xff]  ;;  %v611_v5 = vld [vmem:[#allocation4 + $0x88] sm:$0xff] }
  0x46   : > { %s1915_s16 = sadd.s32 %s1166_s15, %s1165_s14  ;;  %v642_v6 = vld [vmem:[#allocation4 + $0x180] sm:$0xff]  ;;  %v1413_v8 = vpack.c.bf16 %v611_v5, %v610_v4  ;;  %v643_v9 = vld [vmem:[#allocation4 + $0x188] sm:$0xff]  ;;  %v612_v18 = vld [vmem:[#allocation4 + $0x90] sm:$0xff]  ;;  %p2459_p11 = scmp.ne.s32.totalorder %s2452_s4, 0 }
  0x47   : > { %s1918_s8 = sld [smem:[#allocation3 + %s1915_s16]]  ;;  %s134_s12 = sadd.s32 1, %s1915_s16  ;;  %v1921_v1 = vshrl.u32 %v196_v0, 7  ;;  %v1926_v2 = vand.u32 127, %v196_v0  ;;  %v594_v10 = vld [vmem:[#allocation4] sm:$0xff]  ;;  %v595_v11 = vld [vmem:[#allocation4 + $0x8] sm:$0xff]  ;;  %v1445_v14 = vpack.c.bf16 %v643_v9, %v642_v6 }
  0x48   : > { %s1923_s9 = sld [smem:[#allocation3 + %s134_s12]]  ;;  %s136_s13 = sadd.s32 2, %s1915_s16  ;;  %v1415_v15 = vpack.c.bf16 %v595_v11, %v594_v10  ;;  %v626_v16 = vld [vmem:[#allocation4 + $0x100] sm:$0xff]  ;;  %v627_v17 = vld [vmem:[#allocation4 + $0x108] sm:$0xff]  ;;  %1414 = vmatprep.subr.bf16.mxu0 %v1413_v8  ;;  %v613_v22 = vld [vmem:[#allocation4 + $0x98] sm:$0xff] }
  0x49   : > { %s1928_s17 = sld [smem:[#allocation3 + %s136_s13]]  ;;  %s138_s18 = sadd.s32 3, %s1915_s16  ;;  %vm201_vm0 = vcmp.eq.s32.totalorder %v1921_v1, 0  ;;  %vm210_vm1 = vcmp.eq.s32.totalorder %v1921_v1, 1  ;;  %vm219_vm2 = vcmp.eq.s32.totalorder %v1921_v1, 2  ;;  %vm228_vm3 = vcmp.eq.s32.totalorder %v1921_v1, 3  ;;  %1446 = vmatprep.subr.bf16.mxu1 %v1445_v14 }
  0x4a   : > { %s1932_s26 = sld [smem:[#allocation3 + %s138_s18]]  ;;  %s140_s27 = sadd.s32 4, %s1915_s16  ;;  %vm237_vm4 = vcmp.eq.s32.totalorder %v1921_v1, 4  ;;  %vm246_vm5 = vcmp.eq.s32.totalorder %v1921_v1, 5  ;;  %vm255_vm6 = vcmp.eq.s32.totalorder %v1921_v1, 6  ;;  %vm264_vm7 = vcmp.eq.s32.totalorder %v1921_v1, 7  ;;  %1416 = vmatpush3.bf16.msra.mxu0 %v1415_v15 }
  0x4b   : > { %s1939_s30 = sld [smem:[#allocation3 + %s140_s27]]  ;;  %s142_s3 = sadd.s32 5, %s1915_s16  ;;  %v1946_v3 = vadd.s32 8, %v1921_v1  ;;  %v1952_v7 = vadd.s32 128, %v1926_v2  ;;  %v1959_v13 = vadd.s32 384, %v1926_v2  ;;  %v1447_v21 = vpack.c.bf16 %v627_v17, %v626_v16  ;;  %v644_v23 = vld [vmem:[#allocation4 + $0x190] sm:$0xff] }
  0x4c   : > { %s1948_s6 = sld [smem:[#allocation3 + %s142_s3]]  ;;  %s144_s7 = sadd.s32 6, %s1915_s16  ;;  %v645_v24 = vld [vmem:[#allocation4 + $0x198] sm:$0xff]  ;;  %v1417_v27 = vpack.c.bf16 %v613_v22, %v612_v18  ;;  %v596_v29 = vld [vmem:[#allocation4 + $0x10] sm:$0xff]  ;;  %v614_v36 = vld [vmem:[#allocation4 + $0xa0] sm:$0xff]  ;;  %v1773_v14 = vmov 1.0  }
  0x4d   : > { %s1954_s11 = sld [smem:[#allocation3 + %s144_s7]]  ;;  %s146_s14 = sadd.s32 7, %s1915_s16  ;;  %v205_v12 = vstv %s1918_s8  ;;  %vm274_vm8 = vcmp.eq.s32.totalorder %v1946_v3, 8  ;;  %v1449_v28 = vpack.c.bf16 %v645_v24, %v644_v23  ;;  %v597_v30 = vld [vmem:[#allocation4 + $0x18] sm:$0xff]  ;;  %v628_v31 = vld [vmem:[#allocation4 + $0x110] sm:$0xff]  ;;  %1448 = vmatpush3.bf16.msra.mxu1 %v1447_v21  ;;  %v615_v37 = vld [vmem:[#allocation4 + $0xa8] sm:$0xff] }
  0x4e   : > { %s1961_s15 = sld [smem:[#allocation3 + %s146_s14]]  ;;  %v206_v19 = vsel %vm201_vm0, %v205_v12, 0  ;;  %v214_v20 = vstv %s1923_s9  ;;  %s148_s12 = sadd.s32 8, %s1915_s16  ;;  %v1419_v34 = vpack.c.bf16 %v597_v30, %v596_v29  ;;  %v629_v35 = vld [vmem:[#allocation4 + $0x118] sm:$0xff]  ;;  %vm283_vm9 = vcmp.eq.s32.totalorder %v1946_v3, 9  ;;  %1418 = vmatprep.subr.bf16.mxu0 %v1417_v27  ;;  %v646_v42 = vld [vmem:[#allocation4 + $0x1a0] sm:$0xff] }
  0x4f   : > { %v215_v25 = vsel %vm210_vm1, %v214_v20, %v206_v19  ;;  %v223_v26 = vstv %s1928_s17  ;;  %s1970_s8 = sld [smem:[#allocation3 + %s148_s12]]  ;;  %s150_s13 = sadd.s32 9, %s1915_s16  ;;  %1450 = vmatprep.subr.bf16.mxu1 %v1449_v28  ;;  %v1451_v40 = vpack.c.bf16 %v629_v35, %v628_v31  ;;  %v1421_v41 = vpack.c.bf16 %v615_v37, %v614_v36  ;;  %v647_v43 = vld [vmem:[#allocation4 + $0x1a8] sm:$0xff]  ;;  %v598_v44 = vld [vmem:[#allocation4 + $0x20] sm:$0xff]  ;;  %v616_v54 = vld [vmem:[#allocation4 + $0xb0] sm:$0xff] }
  0x50   : > { %v224_v32 = vsel %vm219_vm2, %v223_v26, %v215_v25  ;;  %v232_v33 = vstv %s1932_s26  ;;  %s1977_s9 = sld [smem:[#allocation3 + %s150_s13]]  ;;  %s152_s17 = sadd.s32 10, %s1915_s16  ;;  %v1453_v47 = vpack.c.bf16 %v647_v43, %v646_v42  ;;  %v599_v48 = vld [vmem:[#allocation4 + $0x28] sm:$0xff]  ;;  %v630_v49 = vld [vmem:[#allocation4 + $0x120] sm:$0xff]  ;;  %vm292_vm10 = vcmp.eq.s32.totalorder %v1946_v3, 10  ;;  %1420 = vmatpush3.bf16.msra.mxu0 %v1419_v34  ;;  %v617_v55 = vld [vmem:[#allocation4 + $0xb8] sm:$0xff] }
  0x51   : > { %v233_v38 = vsel %vm228_vm3, %v232_v33, %v224_v32  ;;  %v241_v39 = vstv %s1939_s30  ;;  %s1983_s18 = sld [smem:[#allocation3 + %s152_s17]]  ;;  %s154_s27 = sadd.s32 11, %s1915_s16  ;;  %v631_v50 = vld [vmem:[#allocation4 + $0x128] sm:$0xff]  ;;  %v1423_v53 = vpack.c.bf16 %v599_v48, %v598_v44  ;;  %v648_v56 = vld [vmem:[#allocation4 + $0x1b0] sm:$0xff]  ;;  %vm301_vm11 = vcmp.eq.s32.totalorder %v1946_v3, 11  ;;  %1452 = vmatpush3.bf16.msra.mxu1 %v1451_v40  ;;  %1422 = vmatprep.subr.bf16.mxu0 %v1421_v41  ;;  %v649_v61 = vld [vmem:[#allocation4 + $0x1b8] sm:$0xff] }
  0x52   : > { %v242_v45 = vsel %vm237_vm4, %v241_v39, %v233_v38  ;;  %v250_v46 = vstv %s1948_s6  ;;  %s1990_s26 = sld [smem:[#allocation3 + %s154_s27]]  ;;  %s156_s30 = sadd.s32 12, %s1915_s16  ;;  %v1455_v59 = vpack.c.bf16 %v631_v50, %v630_v49  ;;  %v1425_v60 = vpack.c.bf16 %v617_v55, %v616_v54  ;;  %v600_v62 = vld [vmem:[#allocation4 + $0x30] sm:$0xff]  ;;  %v601_v63 = vld [vmem:[#allocation4 + $0x38] sm:$0xff]  ;;  %1454 = vmatprep.subr.bf16.mxu1 %v1453_v47  ;;  %v618_v9 = vld [vmem:[#allocation4 + $0xc0] sm:$0xff] }
  0x53   : > { %v251_v51 = vsel %vm246_vm5, %v250_v46, %v242_v45  ;;  %v259_v52 = vstv %s1954_s11  ;;  %s1996_s3 = sld [smem:[#allocation3 + %s156_s30]]  ;;  %s158_s7 = sadd.s32 13, %s1915_s16  ;;  %v1457_v5 = vpack.c.bf16 %v649_v61, %v648_v56  ;;  %v632_v6 = vld [vmem:[#allocation4 + $0x130] sm:$0xff]  ;;  %v633_v8 = vld [vmem:[#allocation4 + $0x138] sm:$0xff]  ;;  %vm310_vm14 = vcmp.eq.s32.totalorder %v1946_v3, 12  ;;  %v619_v10 = vld [vmem:[#allocation4 + $0xc8] sm:$0xff] }
  0x54   : > { %v260_v57 = vsel %vm255_vm6, %v259_v52, %v251_v51  ;;  %v268_v58 = vstv %s1961_s15  ;;  %s2003_s6 = sld [smem:[#allocation3 + %s158_s7]]  ;;  %s160_s14 = sadd.s32 14, %s1915_s16  ;;  %v650_v11 = vld [vmem:[#allocation4 + $0x1c0] sm:$0xff]  ;;  %v651_v12 = vld [vmem:[#allocation4 + $0x1c8] sm:$0xff]  ;;  %1424 = vmatpush3.bf16.msra.mxu0 %v1423_v53  ;;  %v1427_v16 = vpack.c.bf16 %v601_v63, %v600_v62  ;;  %v1459_v17 = vpack.c.bf16 %v633_v8, %v632_v6  ;;  %v620_v25 = vld [vmem:[#allocation4 + $0xd0] sm:$0xff] }
  0x55   : > { %v2009_v0 = vsel %vm264_vm7, %v268_v58, %v260_v57  ;;  %s2011_s11 = sld [smem:[#allocation3 + %s160_s14]]  ;;  %v277_v4 = vstv %s1970_s8  ;;  %s162_s15 = sadd.s32 15, %s1915_s16  ;;  %v602_v18 = vld [vmem:[#allocation4 + $0x40] sm:$0xff]  ;;  %v603_v19 = vld [vmem:[#allocation4 + $0x48] sm:$0xff]  ;;  %1456 = vmatpush3.bf16.msra.mxu1 %v1455_v59  ;;  %1426 = vmatprep.subr.bf16.mxu0 %v1425_v60  ;;  %v1429_v22 = vpack.c.bf16 %v619_v10, %v618_v9  ;;  %v1461_v29 = vpack.c.bf16 %v651_v12, %v650_v11  ;;  %v621_v30 = vld [vmem:[#allocation4 + $0xd8] sm:$0xff] }
  0x56   : > { %vm499_vm12 = vcmp.eq.s32.totalorder %v2009_v0, %v1952_v7  ;;  %vm501_vm13 = vcmp.eq.s32.totalorder %v2009_v0, %v1959_v13  ;;  %s164_s12 = sadd.s32 16, %s1915_s16  ;;  %v279_v15 = vsel %vm274_vm8, %v277_v4, 0  ;;  %s166_s13 = sadd.s32 17, %s1915_s16  ;;  %v286_v20 = vstv %s1977_s9  ;;  %v634_v23 = vld [vmem:[#allocation4 + $0x140] sm:$0xff]  ;;  %v635_v24 = vld [vmem:[#allocation4 + $0x148] sm:$0xff]  ;;  %1458 = vmatprep.subr.bf16.mxu1 %v1457_v5  ;;  %v652_v31 = vld [vmem:[#allocation4 + $0x1d0] sm:$0xff] }
  0x57   : > { %1199 = vmatprep.mubr.msk.f32.mxu0 %vm499_vm12, %v1773_v14  ;;  %1207 = vmatprep.mubr.msk.f32.mxu1 %vm501_vm13, %v1773_v14  ;;  %s2025_s8 = sld [smem:[#allocation3 + %s164_s12]]  ;;  %v295_v21 = vstv %s1983_s18  ;;  %s168_s17 = sadd.s32 18, %s1915_s16  ;;  %v288_v26 = vsel %vm283_vm9, %v286_v20, %v279_v15  ;;  %v653_v32 = vld [vmem:[#allocation4 + $0x1d8] sm:$0xff]  ;;  %v2044_v34 = vadd.s32 16, %v1921_v1  ;;  %vm319_vm15 = vcmp.eq.s32.totalorder %v1946_v3, 13  ;;  %v604_v38 = vld [vmem:[#allocation4 + $0x50] sm:$0xff] }
  0x58   : > { %s2031_s27 = sld [smem:[#allocation3 + %s162_s15]]  ;;  %v304_v27 = vstv %s1990_s26  ;;  %s170_s30 = sadd.s32 19, %s1915_s16  ;;  %v297_v33 = vsel %vm292_vm10, %v295_v21, %v288_v26  ;;  %1428 = vmatpush3.bf16.msra.mxu0 %v1427_v16  ;;  %v1431_v37 = vpack.c.bf16 %v603_v19, %v602_v18  ;;  %v605_v39 = vld [vmem:[#allocation4 + $0x58] sm:$0xff]  ;;  %v2052_v40 = vld [vmem:[#allocation4 + $0x150] sm:$0xff]  ;;  %v1463_v42 = vpack.c.bf16 %v635_v24, %v634_v23  ;;  %v622_v46 = vld [vmem:[#allocation4 + $0xe0] sm:$0xff] }
  0x59   : > { %v313_v28 = vstv %s1996_s3  ;;  %s2040_s9 = sld [smem:[#allocation3 + %s166_s13]]  ;;  %s172_s18 = sadd.s32 20, %s1915_s16  ;;  %v306_v35 = vsel %vm301_vm11, %v304_v27, %v297_v33  ;;  %1460 = vmatpush3.bf16.msra.mxu1 %v1459_v17  ;;  %1430 = vmatprep.subr.bf16.mxu0 %v1429_v22  ;;  %v1433_v43 = vpack.c.bf16 %v621_v30, %v620_v25  ;;  %v1465_v44 = vpack.c.bf16 %v653_v32, %v652_v31  ;;  %v637_v45 = vld [vmem:[#allocation4 + $0x158] sm:$0xff]  ;;  %v623_v47 = vld [vmem:[#allocation4 + $0xe8] sm:$0xff]  ;;  %v654_v50 = vld [vmem:[#allocation4 + $0x1e0] sm:$0xff] }
  0x5a   : > { %v322_v36 = vstv %s2003_s6  ;;  %s2050_s26 = sld [smem:[#allocation3 + %s168_s17]]  ;;  %v315_v41 = vsel %vm310_vm14, %v313_v28, %v306_v35  ;;  %s174_s7 = sadd.s32 21, %s1915_s16  ;;  %1462 = vmatprep.subr.bf16.mxu1 %v1461_v29  ;;  %vm328_vm0 = vcmp.eq.s32.totalorder %v1946_v3, 14  ;;  %vm347_vm1 = vcmp.eq.s32.totalorder %v2044_v34, 16  ;;  %v655_v51 = vld [vmem:[#allocation4 + $0x1e8] sm:$0xff]  ;;  %v2072_v56 = vld [vmem:[#allocation4 + $0x60] sm:$0xff] }
  0x5b   : > { %s2056_s3 = sld [smem:[#allocation3 + %s170_s30]]  ;;  %v324_v48 = vsel %vm319_vm15, %v322_v36, %v315_v41  ;;  %v331_v49 = vstv %s2011_s11  ;;  %s176_s14 = sadd.s32 22, %s1915_s16  ;;  %v1435_v53 = vpack.c.bf16 %v605_v39, %v604_v38  ;;  %v1467_v54 = vpack.c.bf16 %v637_v45, %v2052_v40  ;;  %v2074_v57 = vld [vmem:[#allocation4 + $0x68] sm:$0xff]  ;;  %v2077_v58 = vld [vmem:[#allocation4 + $0x160] sm:$0xff]  ;;  %v624_v4 = vld [vmem:[#allocation4 + $0xf0] sm:$0xff] }
  0x5c   : > { %s2059_s6 = sld [smem:[#allocation3 + %s172_s18]]  ;;  %s180_s12 = sadd.s32 24, %s1915_s16  ;;  %1432 = vmatpush3.bf16.msra.mxu0 %v1431_v37  ;;  %v1437_v55 = vpack.c.bf16 %v623_v47, %v622_v46  ;;  %vm356_vm2 = vcmp.eq.s32.totalorder %v2044_v34, 17  ;;  %v2079_v59 = vld [vmem:[#allocation4 + $0x168] sm:$0xff]  ;;  %v333_v60 = vsel %vm328_vm0, %v331_v49, %v324_v48  ;;  %vm337_vm3 = vcmp.eq.s32.totalorder %v1946_v3, 15  ;;  %v625_v5 = vld [vmem:[#allocation4 + $0xf8] sm:$0xff] }
  0x5d   : > { %s2067_s15 = sld [smem:[#allocation3 + %s174_s7]]  ;;  %v349_v52 = vstv %s2025_s8  ;;  %1464 = vmatpush3.bf16.msra.mxu1 %v1463_v42  ;;  %1434 = vmatprep.subr.bf16.mxu0 %v1433_v43  ;;  %s178_s8 = sadd.s32 23, %s1915_s16  ;;  %v1469_v63 = vpack.c.bf16 %v655_v51, %v654_v50  ;;  %v2091_v6 = vadd.s32 256, %v1926_v2  ;;  %vm365_vm4 = vcmp.eq.s32.totalorder %v2044_v34, 18  ;;  %v656_v10 = vld [vmem:[#allocation4 + $0x1f0] sm:$0xff]  ;;  %v657_v11 = vld [vmem:[#allocation4 + $0x1f8] sm:$0xff] }
  0x5e   : > { %v340_v61 = vstv %s2031_s27  ;;  %s2085_s11 = sld [smem:[#allocation3 + %s176_s14]]  ;;  %v352_v62 = vsel %vm347_vm1, %v349_v52, 0  ;;  %1466 = vmatprep.subr.bf16.mxu1 %v1465_v44  ;;  %s182_s17 = sadd.s32 25, %s1915_s16  ;;  %v1439_v9 = vpack.c.bf16 %v2074_v57, %v2072_v56  ;;  %vm374_vm5 = vcmp.eq.s32.totalorder %v2044_v34, 19  ;;  %v2107_v17 = vld [vmem:[#allocation4 + $0x70] sm:$0xff]  ;;  %v2109_v18 = vld [vmem:[#allocation4 + $0x78] sm:$0xff] }
  0x5f   : > { %v358_v8 = vstv %s2040_s9  ;;  %s2095_s13 = sld [smem:[#allocation3 + %s180_s12]]  ;;  %s184_s27 = sadd.s32 26, %s1915_s16  ;;  %v1471_v16 = vpack.c.bf16 %v2079_v59, %v2077_v58  ;;  %v2111_v19 = vld [vmem:[#allocation4 + $0x170] sm:$0xff]  ;;  %v2115_v20 = vsel %vm337_vm3, %v340_v61, %v333_v60  ;;  %v1441_v23 = vpack.c.bf16 %v625_v5, %v624_v4  ;;  %v2123_v24 = vld [vmem:[#allocation4 + $0x178] sm:$0xff]  ;;  %v2125_v25 = vld [vmem:[#allocation4 + $0x280] sm:$0xff] }
  0x60   : > { %v361_v12 = vsel %vm356_vm2, %v358_v8, %v352_v62  ;;  %v367_v15 = vstv %s2050_s26  ;;  %1436 = vmatpush3.bf16.msra.mxu0 %v1435_v53  ;;  %s2117_s30 = sld [smem:[#allocation3 + %s178_s8]]  ;;  %s186_s9 = sadd.s32 27, %s1915_s16  ;;  %v2127_v26 = vld [vmem:[#allocation4 + $0x288] sm:$0xff]  ;;  %vm383_vm6 = vcmp.eq.s32.totalorder %v2044_v34, 20  ;;  %v1473_v28 = vpack.c.bf16 %v657_v11, %v656_v10  ;;  %v2135_v29 = vld [vmem:[#allocation4 + $0x200] sm:$0xff]  ;;  %v2161_v41 = vld [vmem:[#allocation4 + $0x290] sm:$0xff] }
  0x61   : > { %v370_v21 = vsel %vm365_vm4, %v367_v15, %v361_v12  ;;  %v376_v22 = vstv %s2056_s3  ;;  %1468 = vmatpush3.bf16.msra.mxu1 %v1467_v54  ;;  %1438 = vmatprep.subr.bf16.mxu0 %v1437_v55  ;;  %s2133_s18 = sld [smem:[#allocation3 + %s182_s17]]  ;;  %v2137_v30 = vld [vmem:[#allocation4 + $0x208] sm:$0xff]  ;;  %vm392_vm7 = vcmp.eq.s32.totalorder %v2044_v34, 21  ;;  %s188_s3 = sadd.s32 28, %s1915_s16  ;;  %vm498_vm8 = vcmp.eq.s32.totalorder %v2009_v0, %v1926_v2  ;;  %v706_v32 = vld [vmem:[#allocation4 + $0x380] sm:$0xff]  ;;  %v2163_v42 = vld [vmem:[#allocation4 + $0x298] sm:$0xff] }
  0x62   : > { %v379_v3 = vsel %vm374_vm5, %v376_v22, %v370_v21  ;;  %v385_v27 = vstv %s2059_s6  ;;  %1470 = vmatprep.subr.bf16.mxu1 %v1469_v63  ;;  %s2140_s26 = sld [smem:[#allocation3 + %s184_s27]]  ;;  %vm500_vm9 = vcmp.eq.s32.totalorder %v2009_v0, %v2091_v6  ;;  %v707_v33 = vld [vmem:[#allocation4 + $0x388] sm:$0xff]  ;;  %v2147_v35 = vld [vmem:[#allocation4 + $0x300] sm:$0xff]  ;;  %s190_s6 = sadd.s32 29, %s1915_s16  ;;  %v1443_v37 = vpack.c.bf16 %v2109_v18, %v2107_v17  ;;  %v2178_v47 = vld [vmem:[#allocation4 + $0x210] sm:$0xff] }
  0x63   : > { %v388_v31 = vsel %vm383_vm6, %v385_v27, %v379_v3  ;;  %v394_v36 = vstv %s2067_s15  ;;  %s2150_s7 = sld [smem:[#allocation3 + %s186_s9]]  ;;  %v1475_v38 = vpack.c.bf16 %v2123_v24, %v2111_v19  ;;  %v1477_v39 = vpack.c.bf16 %v2127_v26, %v2125_v25  ;;  %v2159_v40 = vld [vmem:[#allocation4 + $0x308] sm:$0xff]  ;;  %s192_s14 = sadd.s32 30, %s1915_s16  ;;  %v2180_v48 = vld [vmem:[#allocation4 + $0x218] sm:$0xff]  ;;  %v708_v49 = vld [vmem:[#allocation4 + $0x390] sm:$0xff] }
  0x64   : > { %1440 = vmatpush3.bf16.msra.mxu0 %v1439_v9  ;;  %vm507_vm10 = vcmp.eq.s32.totalorder %v2115_v20, %v1952_v7  ;;  %v397_v43 = vsel %vm392_vm7, %v394_v36, %v388_v31  ;;  %vm401_vm11 = vcmp.eq.s32.totalorder %v2044_v34, 22  ;;  %v403_v44 = vstv %s2085_s11  ;;  %s2172_s15 = sld [smem:[#allocation3 + %s188_s3]]  ;;  %s194_s12 = sadd.s32 31, %s1915_s16  ;;  %v709_v53 = vld [vmem:[#allocation4 + $0x398] sm:$0xff]  ;;  %v2195_v54 = vld [vmem:[#allocation4 + $0x310] sm:$0xff]  ;;  %v2203_v56 = vld [vmem:[#allocation4 + $0x2a0] sm:$0xff] }
  0x65   : > { %1472 = vmatpush3.bf16.msra.mxu1 %v1471_v16  ;;  %1442 = vmatprep.subr.bf16.mxu0 %v1441_v23  ;;  %v2176_v45 = vadd.s32 24, %v1921_v1  ;;  %v1509_v46 = vpack.c.bf16 %v707_v33, %v706_v32  ;;  %vm509_vm12 = vcmp.eq.s32.totalorder %v2115_v20, %v1959_v13  ;;  %vm506_vm13 = vcmp.eq.s32.totalorder %v2115_v20, %v1926_v2  ;;  %s2186_s11 = sld [smem:[#allocation3 + %s190_s6]]  ;;  %v2197_v55 = vld [vmem:[#allocation4 + $0x318] sm:$0xff]  ;;  %v679_v60 = vld [vmem:[#allocation4 + $0x2a8] sm:$0xff]  ;;  %v2214_v61 = vld [vmem:[#allocation4 + $0x220] sm:$0xff]  ;;  %s1233_s9 = sshll.u32 %s1755_s23, 3 }
  0x66   : > { %1474 = vmatprep.subr.bf16.mxu1 %v1473_v28  ;;  %v421_v50 = vstv %s2095_s13  ;;  %v1479_v1 = vpack.c.bf16 %v2137_v30, %v2135_v29  ;;  %v1511_v51 = vpack.c.bf16 %v2159_v40, %v2147_v35  ;;  %v1481_v52 = vpack.c.bf16 %v2163_v42, %v2161_v41  ;;  %s2201_s16 = sld [smem:[#allocation3 + %s192_s14]]  ;;  %v2216_v62 = vld [vmem:[#allocation4 + $0x228] sm:$0xff]  ;;  %v710_v9 = vld [vmem:[#allocation4 + $0x3a0] sm:$0xff]  ;;  %v680_v26 = vld [vmem:[#allocation4 + $0x2b0] sm:$0xff]  ;;  %s126_s13 = sand.u32 1, %s1743_s20  }
  0x67   : > { %vm508_vm14 = vcmp.eq.s32.totalorder %v2115_v20, %v2091_v6  ;;  %v406_v57 = vsel %vm401_vm11, %v403_v44, %v397_v43  ;;  %vm410_vm15 = vcmp.eq.s32.totalorder %v2044_v34, 23  ;;  %v412_v58 = vstv %s2117_s30  ;;  %s2209_s8 = sld [smem:[#allocation3 + %s194_s12]]  ;;  %v711_v10 = vld [vmem:[#allocation4 + $0x3a8] sm:$0xff]  ;;  %v2227_v12 = vld [vmem:[#allocation4 + $0x320] sm:$0xff]  ;;  %v681_v3 = vld [vmem:[#allocation4 + $0x2b8] sm:$0xff]  ;;  %s1164_s17 = sshll.u32 %s126_s13, 5 }
  0x68   : > { %1444 = vmatpush3.bf16.msra.mxu0 %v1443_v37  ;;  %vm420_vm0 = vcmp.eq.s32.totalorder %v2176_v45, 24  ;;  %v1483_v59 = vpack.c.bf16 %v2180_v48, %v2178_v47  ;;  %vm429_vm1 = vcmp.eq.s32.totalorder %v2176_v45, 25  ;;  %v430_v4 = vstv %s2133_s18  ;;  %v2229_v15 = vld [vmem:[#allocation4 + $0x328] sm:$0xff]  ;;  %v712_v29 = vld [vmem:[#allocation4 + $0x3b0] sm:$0xff]  ;;  %v713_v30 = vld [vmem:[#allocation4 + $0x3b8] sm:$0xff]  ;;  %s2375_s27 = scalar_lea.vmem [#allocation7], %s1164_s17 }
  0x69   : > { %1476 = vmatpush3.bf16.msra.mxu1 %v1475_v38  ;;  %1478 = vmatprep.subr.bf16.mxu0 %v1477_v39  ;;  %v425_v63 = vsel %vm420_vm0, %v421_v50, 0  ;;  %v1513_v5 = vpack.c.bf16 %v709_v53, %v708_v49  ;;  %v1515_v8 = vpack.c.bf16 %v2197_v55, %v2195_v54  ;;  %vm438_vm2 = vcmp.eq.s32.totalorder %v2176_v45, 26  ;;  %v664_v37 = vld [vmem:[#allocation4 + $0x230] sm:$0xff]  ;;  %v665_v38 = vld [vmem:[#allocation4 + $0x238] sm:$0xff]  ;;  %v682_v43 = vld [vmem:[#allocation4 + $0x2c0] sm:$0xff]  ;;  %s1232_s30 = sshll.u32 %s1751_s22, 2 }
  0x6a   : > { %1510 = vmatprep.subr.bf16.mxu1 %v1509_v46  ;;  %v434_v11 = vsel %vm429_vm1, %v430_v4, %v425_v63  ;;  %v2233_v16 = vsel %vm410_vm15, %v412_v58, %v406_v57  ;;  %v439_v17 = vstv %s2140_s26  ;;  %vm447_vm3 = vcmp.eq.s32.totalorder %v2176_v45, 27  ;;  %v696_v39 = vld [vmem:[#allocation4 + $0x330] sm:$0xff]  ;;  %v697_v42 = vld [vmem:[#allocation4 + $0x338] sm:$0xff]  ;;  %v683_v44 = vld [vmem:[#allocation4 + $0x2c8] sm:$0xff]  ;;  %s1079_s18 = sadd.s32 %s1233_s9, %s1232_s30  ;;  %s1082_s26 = sshll.u32 %s2375_s27, 4  ;;  %s2383_s26 = int_to_ptr.vmem [resolvable:$true] %s1082_s26 }
  0x6b   : > { %1200 = vmatmul.mubr.msk.f32.vlgmr.msra.gmra.mrb[0].mxu0 %vm498_vm8, %v1773_v14  ;;  %v448_v18 = vstv %s2150_s7  ;;  %v1485_v19 = vpack.c.bf16 %v679_v60, %v2203_v56  ;;  %v1487_v21 = vpack.c.bf16 %v2216_v62, %v2214_v61  ;;  %v443_v22 = vsel %vm438_vm2, %v439_v17, %v434_v11  ;;  %v715_v46 = vld [vmem:[#allocation4 + $0x3c8] sm:$0xff]  ;;  %v698_v53 = vld [vmem:[#allocation4 + $0x340] sm:$0xff]  ;;  %v684_v56 = vld [vmem:[#allocation4 + $0x2d0] sm:$0xff]  ;;  %s1234_s22 = sshll.u32 %s1079_s18, 7  ;;  %s2393_s6 = scalar_lea.sflag [#allocation6], %s126_s13 }
  0x6c   : > { %1208 = vmatmul.mubr.msk.f32.vlgmr.msra.gmra.mrb[0].mxu1 %vm500_vm9, %v1773_v14  ;;  %1480 = vmatpush3.bf16.msra.mxu0 %v1479_v1  ;;  %vm456_vm4 = vcmp.eq.s32.totalorder %v2176_v45, 28  ;;  %v1517_v34 = vpack.c.bf16 %v711_v10, %v710_v9  ;;  %v452_v23 = vsel %vm447_vm3, %v448_v18, %v443_v22  ;;  %v457_v24 = vstv %s2172_s15  ;;  %v699_v55 = vld [vmem:[#allocation4 + $0x348] sm:$0xff]  ;;  %v685_v57 = vld [vmem:[#allocation4 + $0x2d8] sm:$0xff]  ;;  %v716_v58 = vld [vmem:[#allocation4 + $0x3d0] sm:$0xff]  ;;  %s2388_s7 = scalar_lea.hbm %s2447_s2, %s1234_s22  ;;  %s1667_s14 = scalar_lea.vmem %s2383_s26, 512 }
  0x6d   : > { %1512 = vmatpush3.bf16.msra.mxu1 %v1511_v51  ;;  %1482 = vmatprep.subr.bf16.mxu0 %v1481_v52  ;;  %vm465_vm5 = vcmp.eq.s32.totalorder %v2176_v45, 29  ;;  %v1519_v25 = vpack.c.bf16 %v2229_v15, %v2227_v12  ;;  %vm515_vm6 = vcmp.eq.s32.totalorder %v2233_v16, %v1952_v7  ;;  %v461_v27 = vsel %vm456_vm4, %v457_v24, %v452_v23  ;;  %v666_v51 = vld [vmem:[#allocation4 + $0x240] sm:$0xff]  ;;  %v667_v52 = vld [vmem:[#allocation4 + $0x248] sm:$0xff]  ;;  %v668_v60 = vld [vmem:[#allocation4 + $0x250] sm:$0xff]  ;;  %p1668_p6 = scmp.ne.s32.totalorder %s2383_s26, %s1667_s14  ;;  %s1774_s15 = smov [#allocation7]  }
  0x6e   : > { %1514 = vmatprep.subr.bf16.mxu1 %v1513_v5  ;;  %1201 = vmatprep.mubr.msk.f32.mxu0 %vm507_vm10, %v1773_v14  ;;  %v466_v28 = vstv %s2186_s11  ;;  %vm517_vm7 = vcmp.eq.s32.totalorder %v2233_v16, %v1959_v13  ;;  %vm474_vm8 = vcmp.eq.s32.totalorder %v2176_v45, 30  ;;  %v475_v32 = vstv %s2201_s16  ;;  %v669_v61 = vld [vmem:[#allocation4 + $0x258] sm:$0xff]  ;;  %v700_v62 = vld [vmem:[#allocation4 + $0x350] sm:$0xff]  ;;  %v686_v5 = vld [vmem:[#allocation4 + $0x2e0] sm:$0xff]  ;;  %s1671_s12 = sshll.u32 %s1774_s15, 4  ;;  %s1672_s12 = int_to_ptr.vmem [resolvable:$false] %s1671_s12 }
  0x6f   : > { %1209 = vmatprep.mubr.msk.f32.mxu1 %vm509_vm12, %v1773_v14  ;;  %1202 = vmatmul.mubr.msk.f32.gmra.mrb[2].mxu0 %vm506_vm13, %v1773_v14  ;;  %v470_v31 = vsel %vm465_vm5, %v466_v28, %v461_v27  ;;  %vm514_vm9 = vcmp.eq.s32.totalorder %v2233_v16, %v1926_v2  ;;  %vm483_vm10 = vcmp.eq.s32.totalorder %v2176_v45, 31  ;;  %v484_v35 = vstv %s2209_s8  ;;  %v714_v45 = vld [vmem:[#allocation4 + $0x3c0] sm:$0xff]  ;;  %v701_v4 = vld [vmem:[#allocation4 + $0x358] sm:$0xff]  ;;  %v719_v10 = vld [vmem:[#allocation4 + $0x3e8] sm:$0xff]  ;;  %p1669_p13 = pnand %p1668_p6, %p2459_p11  ;;  %s1673_s11 = scalar_lea.vmem %s1672_s12, 1024 }
  0x70   : > { %1484 = vmatpush3.bf16.msra.mxu0 %v1483_v59  ;;  %1210 = vmatmul.mubr.msk.f32.gmra.mrb[2].mxu1 %vm508_vm14, %v1773_v14  ;;  %v479_v33 = vsel %vm474_vm8, %v475_v32, %v470_v31  ;;  %v1489_v36 = vpack.c.bf16 %v681_v3, %v680_v26  ;;  %vm516_vm11 = vcmp.eq.s32.totalorder %v2233_v16, %v2091_v6  ;;  %v2296_v47 = vadd.s32 640, %v1926_v2  ;;  %v717_v59 = vld [vmem:[#allocation4 + $0x3d8] sm:$0xff]  ;;  %v718_v9 = vld [vmem:[#allocation4 + $0x3e0] sm:$0xff]  ;;  %v671_v18 = vld [vmem:[#allocation4 + $0x268] sm:$0xff]  ;;  %p1674_p3 = scmp.lt.s32.totalorder %s2383_s26, %s1672_s12  ;;  %p1675_p5 = scmp.lt.s32.totalorder %s1673_s11, %s1667_s14 }
  0x71   : > { %1516 = vmatpush3.bf16.msra.mxu1 %v1515_v8  ;;  %1486 = vmatprep.subr.bf16.mxu0 %v1485_v19  ;;  %v2279_v40 = vsel %vm483_vm10, %v484_v35, %v479_v33  ;;  %v1521_v41 = vpack.c.bf16 %v713_v30, %v712_v29  ;;  %v1491_v48 = vpack.c.bf16 %v665_v38, %v664_v37  ;;  %v2307_v49 = vadd.s32 896, %v1926_v2  ;;  %v687_v8 = vld [vmem:[#allocation4 + $0x2e8] sm:$0xff]  ;;  %v670_v17 = vld [vmem:[#allocation4 + $0x260] sm:$0xff]  ;;  %v689_v23 = vld [vmem:[#allocation4 + $0x2f8] sm:$0xff]  ;;  %p1670_p1 = pneg %p1669_p13 }
  0x72   : > { %1518 = vmatprep.subr.bf16.mxu1 %v1517_v34  ;;  %1203 = vmatprep.mubr.msk.f32.mxu0 %vm515_vm6, %v1773_v14  ;;  %vm523_vm12 = vcmp.eq.s32.totalorder %v2279_v40, %v1952_v7  ;;  %vm525_vm13 = vcmp.eq.s32.totalorder %v2279_v40, %v1959_v13  ;;  %vm522_vm14 = vcmp.eq.s32.totalorder %v2279_v40, %v1926_v2  ;;  %v702_v19 = vld [vmem:[#allocation4 + $0x360] sm:$0xff]  ;;  %v703_v22 = vld [vmem:[#allocation4 + $0x368] sm:$0xff]  ;;  %v688_v34 = vld [vmem:[#allocation4 + $0x2f0] sm:$0xff]  ;;  %v494_v35 = vadd.s32 512, %v1926_v2  ;;  %p1676_p8 = por %p1675_p5, %p1674_p3 }
  0x73   : > { %1211 = vmatprep.mubr.msk.f32.mxu1 %vm517_vm7, %v1773_v14  ;;  %1204 = vmatmul.mubr.msk.f32.gmra.mrb[4].mxu0 %vm514_vm9, %v1773_v14  ;;  %v1523_v50 = vpack.c.bf16 %v697_v42, %v696_v39  ;;  %v1493_v1 = vpack.c.bf16 %v683_v44, %v682_v43  ;;  %vm524_vm15 = vcmp.eq.s32.totalorder %v2279_v40, %v2091_v6  ;;  %v720_v24 = vld [vmem:[#allocation4 + $0x3f0] sm:$0xff]  ;;  %v673_v29 = vld [vmem:[#allocation4 + $0x278] sm:$0xff]  ;;  %v496_v37 = vadd.s32 768, %v1926_v2 }
  0x74   : > { %1488 = vmatpush3.bf16.msra.mxu0 %v1487_v21  ;;  %1212 = vmatmul.mubr.msk.f32.gmra.mrb[4].mxu1 %vm516_vm11, %v1773_v14  ;;  %v1525_v54 = vpack.c.bf16 %v715_v46, %v714_v45  ;;  %vm503_vm0 = vcmp.eq.s32.totalorder %v2009_v0, %v2296_v47  ;;  %v1495_v6 = vpack.c.bf16 %v667_v52, %v666_v51  ;;  %v672_v28 = vld [vmem:[#allocation4 + $0x270] sm:$0xff]  ;;  %v705_v32 = vld [vmem:[#allocation4 + $0x378] sm:$0xff]  ;;  %p1677_p9 = pnand %p1676_p8, %p1670_p1 }
  0x75   : > { %1520 = vmatpush3.bf16.msra.mxu1 %v1519_v25  ;;  %1490 = vmatprep.subr.bf16.mxu0 %v1489_v36  ;;  %vm505_vm1 = vcmp.eq.s32.totalorder %v2009_v0, %v2307_v49  ;;  %v1527_v7 = vpack.c.bf16 %v699_v55, %v698_v53  ;;  %v1497_v13 = vpack.c.bf16 %v685_v57, %v684_v56  ;;  %v721_v25 = vld [vmem:[#allocation4 + $0x3f8] sm:$0xff]  ;;  %v704_v31 = vld [vmem:[#allocation4 + $0x370] sm:$0xff] }
  0x76   : > { %1522 = vmatprep.subr.bf16.mxu1 %v1521_v41  ;;  %1205 = vmatprep.mubr.msk.f32.mxu0 %vm523_vm12, %v1773_v14  ;;  %v1529_v63 = vpack.c.bf16 %v717_v59, %v716_v58  ;;  %v1499_v11 = vpack.c.bf16 %v669_v61, %v668_v60  ;;  %v1531_v12 = vpack.c.bf16 %v701_v4, %v700_v62 }
  0x77   : > { %1213 = vmatprep.mubr.msk.f32.mxu1 %vm525_vm13, %v1773_v14  ;;  %1206 = vmatmul.mubr.msk.f32.gmra.mrb[6].mxu0 %vm522_vm14, %v1773_v14  ;;  %v1501_v15 = vpack.c.bf16 %v687_v8, %v686_v5  ;;  %v1533_v21 = vpack.c.bf16 %v719_v10, %v718_v9  ;;  %v1503_v26 = vpack.c.bf16 %v671_v18, %v670_v17 }
  0x78   : > { %1492 = vmatpush3.bf16.msra.mxu0 %v1491_v48  ;;  %1214 = vmatmul.mubr.msk.f32.gmra.mrb[6].mxu1 %vm524_vm15, %v1773_v14  ;;  %v1535_v3 = vpack.c.bf16 %v703_v22, %v702_v19  ;;  %v1505_v27 = vpack.c.bf16 %v689_v23, %v688_v34  ;;  %v1537_v30 = vpack.c.bf16 %v721_v25, %v720_v24 }
  0x79   : > { %1524 = vmatpush3.bf16.msra.mxu1 %v1523_v50  ;;  %1494 = vmatprep.subr.bf16.mxu0 %v1493_v1  ;;  %v1507_v33 = vpack.c.bf16 %v673_v29, %v672_v28  ;;  %v1539_v36 = vpack.c.bf16 %v705_v32, %v704_v31  ;;  %vm502_vm2 = vcmp.eq.s32.totalorder %v2009_v0, %v494_v35 }
  0x7a   : > { %1526 = vmatprep.subr.bf16.mxu1 %v1525_v54  ;;  %1215 = vmatprep.mubr.msk.f32.mxu0 %vm503_vm0, %v1773_v14  ;;  %vm504_vm3 = vcmp.eq.s32.totalorder %v2009_v0, %v496_v37  ;;  %vm511_vm4 = vcmp.eq.s32.totalorder %v2115_v20, %v2296_v47  ;;  %vm513_vm5 = vcmp.eq.s32.totalorder %v2115_v20, %v2307_v49 }
  0x7b   : > { %1223 = vmatprep.mubr.msk.f32.mxu1 %vm505_vm1, %v1773_v14  ;;  %vm510_vm6 = vcmp.eq.s32.totalorder %v2115_v20, %v494_v35  ;;  %vm512_vm7 = vcmp.eq.s32.totalorder %v2115_v20, %v496_v37  ;;  %vm519_vm8 = vcmp.eq.s32.totalorder %v2233_v16, %v2296_v47  ;;  %vm521_vm9 = vcmp.eq.s32.totalorder %v2233_v16, %v2307_v49 }
  0x7c   : > { %1496 = vmatpush3.bf16.msra.mxu0 %v1495_v6  ;;  %vm518_vm10 = vcmp.eq.s32.totalorder %v2233_v16, %v494_v35  ;;  %vm520_vm11 = vcmp.eq.s32.totalorder %v2233_v16, %v496_v37  ;;  %vm527_vm12 = vcmp.eq.s32.totalorder %v2279_v40, %v2296_v47  ;;  %vm529_vm13 = vcmp.eq.s32.totalorder %v2279_v40, %v2307_v49 }
  0x7d   : > { %1528 = vmatpush3.bf16.msra.mxu1 %v1527_v7  ;;  %1498 = vmatprep.subr.bf16.mxu0 %v1497_v13  ;;  %vm526_vm14 = vcmp.eq.s32.totalorder %v2279_v40, %v494_v35  ;;  %vm528_vm15 = vcmp.eq.s32.totalorder %v2279_v40, %v496_v37 }
  0x7e   : > { %1530 = vmatprep.subr.bf16.mxu1 %v1529_v63 }
  0x80   : > { %1500 = vmatpush3.bf16.msra.mxu0 %v1499_v11 }
  0x81   : > { %1532 = vmatpush3.bf16.msra.mxu1 %v1531_v12  ;;  %1502 = vmatprep.subr.bf16.mxu0 %v1501_v15 }
  0x82   : > { %1534 = vmatprep.subr.bf16.mxu1 %v1533_v21 }
  0x84   : > { %1504 = vmatpush3.bf16.msra.mxu0 %v1503_v26 }
  0x85   : > { %1536 = vmatpush3.bf16.msra.mxu1 %v1535_v3  ;;  %1506 = vmatprep.subr.bf16.mxu0 %v1505_v27 }
  0x86   : > { %1538 = vmatprep.subr.bf16.mxu1 %v1537_v30 }
  0x88   : > { %1508 = vmatpush3.bf16.msra.mxu0 %v1507_v33 }
  0x89   : > { %1540 = vmatpush3.bf16.msra.mxu1 %v1539_v36 }
  0x8b   : > { %1216 = vmatmul.mubr.msk.f32.vlgmr.msra.gmra.mrb[8].mxu0 %vm502_vm2, %v1773_v14 }
  0x8c   : > { %1224 = vmatmul.mubr.msk.f32.vlgmr.msra.gmra.mrb[8].mxu1 %vm504_vm3, %v1773_v14  ;;  %1217 = vmatprep.mubr.msk.f32.mxu0 %vm511_vm4, %v1773_v14 }
  0x8d   : > { %1225 = vmatprep.mubr.msk.f32.mxu1 %vm513_vm5, %v1773_v14 }
  0x8f   : > { %1218 = vmatmul.mubr.msk.f32.gmra.mrb[10].mxu0 %vm510_vm6, %v1773_v14 }
  0x90   : > { %1226 = vmatmul.mubr.msk.f32.gmra.mrb[10].mxu1 %vm512_vm7, %v1773_v14  ;;  %1219 = vmatprep.mubr.msk.f32.mxu0 %vm519_vm8, %v1773_v14 }
  0x91   : > { %1227 = vmatprep.mubr.msk.f32.mxu1 %vm521_vm9, %v1773_v14 }
  0x93   : > { %1220 = vmatmul.mubr.msk.f32.gmra.mrb[12].mxu0 %vm518_vm10, %v1773_v14 }
  0x94   : > { %1228 = vmatmul.mubr.msk.f32.gmra.mrb[12].mxu1 %vm520_vm11, %v1773_v14  ;;  %1221 = vmatprep.mubr.msk.f32.mxu0 %vm527_vm12, %v1773_v14 }
  0x95   : > { %1229 = vmatprep.mubr.msk.f32.mxu1 %vm529_vm13, %v1773_v14 }
  0x97   : > { %1222 = vmatmul.mubr.msk.f32.gmra.mrb[14].mxu0 %vm526_vm14, %v1773_v14 }
  0x98   : > { %1230 = vmatmul.mubr.msk.f32.gmra.mrb[14].mxu1 %vm528_vm15, %v1773_v14 }
 0x13e   : > { %v1269_v2 = vpop.f32.mrb[0].mxu0 }
 0x13f   : > { %v1313_v0 = vpop.f32.mrb[0].mxu1  ;;  %v1270_v20 = vpop.f32.mrb[1].mxu0 }
 0x140   : > { %v1271_v16 = vadd.f32 %v1270_v20, %v1269_v2  ;;  %v1314_v38 = vpop.f32.mrb[1].mxu1 }
 0x141   : > { %v1315_v39 = vadd.f32 %v1314_v38, %v1313_v0 }
 0x142   : > { %v1272_v41 = vpop.f32.mrb[2].mxu0 }
 0x143   : > { %v874_v42 = vadd.f32 %v1315_v39, %v1271_v16  ;;  %v1316_v43 = vpop.f32.mrb[2].mxu1  ;;  %v1273_v44 = vpop.f32.mrb[3].mxu0 }
 0x144   : > { %v1274_v45 = vadd.f32 %v1273_v44, %v1272_v41  ;;  %v1317_v46 = vpop.f32.mrb[3].mxu1 }
 0x145   : > { %v1318_v47 = vadd.f32 %v1317_v46, %v1316_v43 }
 0x146   : > { %v1275_v48 = vpop.f32.mrb[4].mxu0 }
 0x147   : > { %v879_v40 = vadd.f32 %v1318_v47, %v1274_v45  ;;  %v1319_v49 = vpop.f32.mrb[4].mxu1  ;;  %v1276_v50 = vpop.f32.mrb[5].mxu0 }
 0x148   : > { %v1277_v1 = vadd.f32 %v1276_v50, %v1275_v48  ;;  %v1320_v14 = vpop.f32.mrb[5].mxu1 }
 0x149   : > { %v1321_v51 = vadd.f32 %v1320_v14, %v1319_v49 }
 0x14a   : > { %v1278_v52 = vpop.f32.mrb[6].mxu0 }
 0x14b   : > { %v884_v53 = vadd.f32 %v1321_v51, %v1277_v1  ;;  %v1322_v54 = vpop.f32.mrb[6].mxu1  ;;  %v1279_v55 = vpop.f32.mrb[7].mxu0 }
 0x14c   : > { %v1280_v56 = vadd.f32 %v1279_v55, %v1278_v52  ;;  %v1323_v57 = vpop.f32.mrb[7].mxu1 }
 0x14d   : > { %v1324_v58 = vadd.f32 %v1323_v57, %v1322_v54 }
 0x14f   : > { %v889_v59 = vadd.f32 %v1324_v58, %v1280_v56 }
 0x15e   : > { %v1357_v6 = vpop.f32.mrb[8].mxu0 }
 0x15f   : > { %v1358_v7 = vpop.f32.mrb[9].mxu0  ;;  %v1401_v13 = vpop.f32.mrb[8].mxu1 }
 0x160   : > { %v1359_v60 = vadd.f32 %v1358_v7, %v1357_v6  ;;  %v1402_v61 = vpop.f32.mrb[9].mxu1 }
 0x161   : > { %v1403_v62 = vadd.f32 %v1402_v61, %v1401_v13 }
 0x162   : > { %v959_v63 = vadd.f32 %v1359_v60, %v874_v42  ;;  %v1360_v4 = vpop.f32.mrb[10].mxu0 }
 0x163   : > { %v1361_v5 = vpop.f32.mrb[11].mxu0  ;;  %v1404_v8 = vpop.f32.mrb[10].mxu1 }
 0x164   : > { %v1044_v9 = vadd.f32 %v1403_v62, %v959_v63  ;;  %v1362_v10 = vadd.f32 %v1361_v5, %v1360_v4  ;;  %v1405_v11 = vpop.f32.mrb[11].mxu1 }
 0x165   : > { %v1406_v12 = vadd.f32 %v1405_v11, %v1404_v8 }
 0x166   : > { %1062 = vst [vmem:[%s2375_s27] sm:$0xff] %v1044_v9  ;;  %v964_v15 = vadd.f32 %v1362_v10, %v879_v40  ;;  %v1363_v17 = vpop.f32.mrb[12].mxu0 }
 0x167   : > { %v1364_v18 = vpop.f32.mrb[13].mxu0  ;;  %v1407_v19 = vpop.f32.mrb[12].mxu1 }
 0x168   : > { %v1049_v21 = vadd.f32 %v1406_v12, %v964_v15  ;;  %v1365_v22 = vadd.f32 %v1364_v18, %v1363_v17  ;;  %v1408_v34 = vpop.f32.mrb[13].mxu1 }
 0x169   : > { %v1409_v23 = vadd.f32 %v1408_v34, %v1407_v19 }
 0x16a   : > { %1063 = vst [vmem:[%s2375_s27 + $0x8] sm:$0xff] %v1049_v21  ;;  %v969_v24 = vadd.f32 %v1365_v22, %v884_v53  ;;  %v1366_v25 = vpop.f32.mrb[14].mxu0 }
 0x16b   : > { %v1367_v26 = vpop.f32.mrb[15].mxu0  ;;  %v1410_v3 = vpop.f32.mrb[14].mxu1 }
 0x16c   : > { %v1054_v27 = vadd.f32 %v1409_v23, %v969_v24  ;;  %v1368_v28 = vadd.f32 %v1367_v26, %v1366_v25  ;;  %v1411_v29 = vpop.f32.mrb[15].mxu1 }
 0x16d   : > { %v1412_v30 = vadd.f32 %v1411_v29, %v1410_v3 }
 0x16e   : > { %1064 = vst [vmem:[%s2375_s27 + $0x10] sm:$0xff] %v1054_v27  ;;  %v974_v31 = vadd.f32 %v1368_v28, %v889_v59 }
 0x170   : > { %v1059_v32 = vadd.f32 %v1412_v30, %v974_v31 }
 0x172   : > { %1065 = vst [vmem:[%s2375_s27 + $0x18] sm:$0xff] %v1059_v32 }
 0x173   : > { %1680 = shalt.err (!%p1677_p9)
}
 0x174   : > { %s1681_s16 = scalar_lea.hbm %s2388_s7, 512  ;;  %s1685_s17 = scalar_lea.hbm %s2447_s2, 2048 }
 0x175   : > { %p1682_p10 = scmp.ne.s32.totalorder %s2388_s7, %s1681_s16  ;;  %p1686_p2 = scmp.lt.u32.totalorder %s2388_s7, %s2447_s2 }
 0x176   : > { %p1687_p4 = scmp.lt.u32.totalorder %s1685_s17, %s1681_s16  ;;  %p1689_p6 = scmp.lt.u32.totalorder %s1681_s16, %s2388_s7 }
 0x177   : > { %p1683_p12 = pnand %p1682_p10, %p2459_p11 }
 0x178   : > { %p1688_p7 = por %p1687_p4, %p1686_p2 }
 0x179   : > { %p1684_p0 = pneg %p1683_p12 }
 0x17a   : > { %p1690_p13 = por %p1689_p6, %p1688_p7 }
 0x17c   : > { %p1691_p1 = pnand %p1690_p13, %p1684_p0 }
 0x17e   : > { %1694 = shalt.err (!%p1691_p1)
}
 0x17f   : > { %s1775_s9 = smov 128   ;;  %s1776_s18 = smov 8  }
 0x180   : > { %1545 = dma.vmem_to_hbm [thread:$0]  (%p2459_p11), %s2383_s26, 512, %s2388_s7, %s2393_s6, %s1775_s9, %s1775_s9, %s1776_s18  }
 0x181 PF: > { %p1557_p3 = scmp.ge.s32.totalorder %s1767_s0, 2  ;;  %s1097_s22 = sand.u32 1, %s1739_s19  }
 0x182   : > { %p2460_p5 = scmp.ne.s32.totalorder %s2453_s5, 0  ;;  %s1098_s23 = scalar_lea.sflag [#allocation6], %s1097_s22 }
 0x184   : > { %p1552_p8 = pnand %p1557_p3, %p2460_p5 }
 0x186   : > { %1734 = dma.done.wait (!%p1552_p8), %s1098_s23, 512  }
 0x187   : > { %1736 = vsyncadd (!%p1552_p8), %s1098_s23, 4294966784  ;;  %s20_s0 = sadd.s32 1, %s1767_s0   ;;  %s2461_s19 = smov %s1743_s20 }
 0x188   : > { %p17_p9 = scmp.ge.s32.totalorder %s20_s0, 6   ;;  %s2462_s20 = smov %s1747_s21 }
 0x189   : > { %s2463_s21 = smov %s1883_s10  ;;  %s2464_s22 = smov %s1759_s24 }
 0x18a   : > { %s2465_s23 = smov %s1763_s25  ;;  %s2466_s24 = smov %s2469_s28 }
 0x18b   : > { %s2467_s25 = smov %s2473_s29  ;;  %19 = sbr.rel (!%p17_p9) target bundleno = 18 (0x12), region = 61 }
 0x192   :  { %1103 = vsyncpa [#allocation5], 1 }
 0x193   :  { %1105 = vsyncpa [#allocation5 + $0x1], 1 }
 0x194   :  { %1106 = vsyncpa [#allocation6], 1 }
 0x195   :  { %1108 = vsyncpa [#allocation6 + $0x1], 1 }

</bundles_post_ra>
